<compile_context>
chip_gen: v5e
topology: v5e:2x2
jax: 0.10.0
libtpu: 0.0.40
codegen_flags: <defaults>
</compile_context>

<pallas_src>
import functools

import jax
import jax.numpy as jnp
from jax.experimental import pallas as pl
from jax.experimental.pallas import tpu as pltpu

LANES = 128
SUBLANES = 8
MAX_BLOCK_ROWS = 512   # 512 x 128 x 4B = 256 KiB per f32 input per buffer


def _rmse_kernel(fake_ref, real_ref, out_ref, acc_ref, *,
                 rows, block_rows, blocks_per_part, mask_tail):
    j = pl.program_id(1)

    @pl.when(j == 0)
    def _():
        acc_ref[...] = jnp.zeros_like(acc_ref)

    diff = (real_ref[...].astype(jnp.float32)
            - fake_ref[...].astype(jnp.float32))
    sq = diff * diff

    if mask_tail:
        # Rows beyond the real array (grid overrun / partial last block) hold
        # unspecified data -> zero them before accumulating.
        i = pl.program_id(0)
        base_row = (i * blocks_per_part + j) * block_rows
        row_ids = base_row + jax.lax.broadcasted_iota(jnp.int32, sq.shape, 0)
        sq = jnp.where(row_ids < rows, sq, 0.0)

    acc_ref[...] += sq

    @pl.when(j == pl.num_programs(1) - 1)
    def _():
        # Fold the (block_rows, 128) accumulator into one (8, 128) partial.
        out_ref[0] = jnp.sum(
            acc_ref[...].reshape(block_rows // SUBLANES, SUBLANES, LANES),
            axis=0)


def rmse_loss(fake, real):
    """Matches RMSE.forward: bilinear-resizes `fake` to `real`'s HW if needed,
    then computes sqrt(mean((10*real - 10*fake)**2)) with a Pallas kernel."""
    if fake.shape != real.shape:
        # TODO(synk): bilinear upsample uses jax.image.resize (XLA), not Pallas.
        _, _, H, W = real.shape
        fake = jax.image.resize(fake, fake.shape[:2] + (H, W),
                                method="bilinear")

    n_elements = int(real.size)

    flat_fake = fake.reshape(-1)
    flat_real = real.reshape(-1)

    # Pad only if the flat length isn't already a multiple of one (8,128) tile
    # (zero pads contribute 0 to the sum; mean divides by the true count).
    tile_elems = SUBLANES * LANES
    padded_n = -(-n_elements // tile_elems) * tile_elems
    if padded_n != n_elements:
        flat_fake = jnp.pad(flat_fake, (0, padded_n - n_elements))
        flat_real = jnp.pad(flat_real, (0, padded_n - n_elements))

    rows = padded_n // LANES
    fake2d = flat_fake.reshape(rows, LANES)
    real2d = flat_real.reshape(rows, LANES)

    block_rows = min(MAX_BLOCK_ROWS, rows)          # both multiples of 8
    total_blocks = -(-rows // block_rows)
    n_parts = 2 if total_blocks >= 2 else 1         # v7x: shard across 2 TCs
    blocks_per_part = -(-total_blocks // n_parts)
    grid_blocks = n_parts * blocks_per_part
    mask_tail = (grid_blocks * block_rows != rows)
    needs_clamp = grid_blocks > total_blocks
    last_block = total_blocks - 1

    def in_map(i, j):
        blk = i * blocks_per_part + j
        if needs_clamp:
            blk = jnp.minimum(blk, last_block)      # clamp; data gets masked
        return (blk, 0)

    kernel = functools.partial(
        _rmse_kernel, rows=rows, block_rows=block_rows,
        blocks_per_part=blocks_per_part, mask_tail=mask_tail)

    partials = pl.pallas_call(
        kernel,
        out_shape=jax.ShapeDtypeStruct((n_parts, SUBLANES, LANES), jnp.float32),
        grid_spec=pltpu.PrefetchScalarGridSpec(
            num_scalar_prefetch=0,
            grid=(n_parts, blocks_per_part),
            in_specs=[
                pl.BlockSpec((block_rows, LANES), in_map),
                pl.BlockSpec((block_rows, LANES), in_map),
            ],
            out_specs=pl.BlockSpec((1, SUBLANES, LANES),
                                   lambda i, j: (i, 0, 0)),
            scratch_shapes=[pltpu.VMEM((block_rows, LANES), jnp.float32)],
        ),
        compiler_params=pltpu.CompilerParams(
            dimension_semantics=("parallel", "arbitrary"),
        ),
    )(fake2d, real2d)

    total = jnp.sum(partials)
    # hoisted 10x scale: sqrt(mean((10r - 10f)^2)) == 10 * sqrt(mean((r-f)^2))
    return 10.0 * jnp.sqrt(total / jnp.float32(n_elements))


if __name__ == "__main__":
    key = jax.random.PRNGKey(0)
    k1, k2, k3, k4 = jax.random.split(key, 4)

    # Small NCHW case (single block, single part).
    fake = jax.random.normal(k1, (2, 4, 16, 16), dtype=jnp.float32)
    real = jax.random.normal(k2, (2, 4, 16, 16), dtype=jnp.float32)
    loss = rmse_loss(fake, real)
    jax.block_until_ready(loss)
    ref = jnp.sqrt(jnp.mean(jnp.abs(10.0 * real - 10.0 * fake) ** 2))
    assert jnp.allclose(loss, ref, rtol=1e-4, atol=1e-4), (loss, ref)

    # Larger case exercising multi-block tiling, the 2-part (megacore) split,
    # index clamping and the in-kernel tail mask.
    fake2 = jax.random.normal(k3, (2, 8, 96, 128), dtype=jnp.float32)
    real2 = jax.random.normal(k4, (2, 8, 96, 128), dtype=jnp.float32)
    loss2 = rmse_loss(fake2, real2)
    jax.block_until_ready(loss2)
    ref2 = jnp.sqrt(jnp.mean(jnp.abs(10.0 * real2 - 10.0 * fake2) ** 2))
    assert jnp.allclose(loss2, ref2, rtol=1e-4, atol=1e-4), (loss2, ref2)

    print("KERNEL_OK")
</pallas_src>

<mosaic_0001>
module attributes {stable_mosaic.version = 11 : i64} {
  func.func @_rmse_kernel(%arg0: i32, %arg1: i32, %arg2: memref<16x128xf32, #tpu.memory_space<vmem>>, %arg3: memref<16x128xf32, #tpu.memory_space<vmem>>, %arg4: memref<1x8x128xf32, #tpu.memory_space<vmem>>, %arg5: memref<16x128xf32, #tpu.memory_space<vmem>>) attributes {dimension_semantics = [#tpu.dimension_semantics<parallel>, #tpu.dimension_semantics<arbitrary>], iteration_bounds = array<i64: 1, 1>, scalar_prefetch = 0 : i64, scratch_operands = 1 : i64, tpu.core_type = #tpu.core_type<tc>, window_params = [{transform_indices = @transform_0, window_bounds = array<i64: 16, 128>}, {transform_indices = @transform_1, window_bounds = array<i64: 16, 128>}, {transform_indices = @transform_2, window_bounds = array<i64: 1, 8, 128>}]} {
    %c0_i32 = arith.constant 0 : i32
    %0 = arith.cmpi eq, %arg1, %c0_i32 : i32
    %1 = arith.extui %0 : i1 to i32
    %c0_i32_0 = arith.constant 0 : i32
    %2 = arith.cmpi ne, %1, %c0_i32_0 : i32
    scf.if %2 {
      %cst = arith.constant 0.000000e+00 : f32
      %13 = vector.broadcast %cst : f32 to vector<16x128xf32>
      %c0_10 = arith.constant 0 : index
      %c0_11 = arith.constant 0 : index
      %14 = vector.load %arg5[%c0_10, %c0_11] : memref<16x128xf32, #tpu.memory_space<vmem>>, vector<16x128xf32>
      tpu.vector_store %arg5[%c0_10, %c0_11], %13 {strides = array<i32>} : memref<16x128xf32, #tpu.memory_space<vmem>>, vector<16x128xf32>,
    } else {
    }
    %c0 = arith.constant 0 : index
    %c0_1 = arith.constant 0 : index
    %3 = vector.load %arg3[%c0, %c0_1] : memref<16x128xf32, #tpu.memory_space<vmem>>, vector<16x128xf32>
    %c0_2 = arith.constant 0 : index
    %c0_3 = arith.constant 0 : index
    %4 = vector.load %arg2[%c0_2, %c0_3] : memref<16x128xf32, #tpu.memory_space<vmem>>, vector<16x128xf32>
    %5 = arith.subf %3, %4 : vector<16x128xf32>
    %6 = arith.mulf %5, %5 : vector<16x128xf32>
    %c0_4 = arith.constant 0 : index
    %c0_5 = arith.constant 0 : index
    %7 = vector.load %arg5[%c0_4, %c0_5] : memref<16x128xf32, #tpu.memory_space<vmem>>, vector<16x128xf32>
    %8 = arith.addf %7, %6 : vector<16x128xf32>
    %c0_6 = arith.constant 0 : index
    %c0_7 = arith.constant 0 : index
    %9 = vector.load %arg5[%c0_6, %c0_7] : memref<16x128xf32, #tpu.memory_space<vmem>>, vector<16x128xf32>
    tpu.vector_store %arg5[%c0_6, %c0_7], %8 {strides = array<i32>} : memref<16x128xf32, #tpu.memory_space<vmem>>, vector<16x128xf32>,
    %c0_i32_8 = arith.constant 0 : i32
    %10 = arith.cmpi eq, %arg1, %c0_i32_8 : i32
    %11 = arith.extui %10 : i1 to i32
    %c0_i32_9 = arith.constant 0 : i32
    %12 = arith.cmpi ne, %11, %c0_i32_9 : i32
    scf.if %12 {
      %c0_10 = arith.constant 0 : index
      %c0_11 = arith.constant 0 : index
      %13 = vector.load %arg5[%c0_10, %c0_11] : memref<16x128xf32, #tpu.memory_space<vmem>>, vector<16x128xf32>
      %14 = vector.shape_cast %13 : vector<16x128xf32> to vector<2x8x128xf32>
      %cst = arith.constant dense<0.000000e+00> : vector<8x128xf32>
      %15 = vector.multi_reduction <add>, %14, %cst [0] : vector<2x8x128xf32> to vector<8x128xf32>
      %c0_12 = arith.constant 0 : index
      %c0_13 = arith.constant 0 : index
      %c0_14 = arith.constant 0 : index
      %16 = vector.load %arg4[%c0_12, %c0_13, %c0_14] : memref<1x8x128xf32, #tpu.memory_space<vmem>>, vector<1x8x128xf32>
      %17 = vector.shape_cast %16 : vector<1x8x128xf32> to vector<8x128xf32>
      %18 = vector.shape_cast %15 : vector<8x128xf32> to vector<1x8x128xf32>
      tpu.vector_store %arg4[%c0_12, %c0_13, %c0_14], %18 {strides = array<i32>} : memref<1x8x128xf32, #tpu.memory_space<vmem>>, vector<1x8x128xf32>,
    } else {
    }
    return
  }
  func.func @transform_0(%arg0: i32, %arg1: i32) -> (i32, i32) {
    %c1_i32 = arith.constant 1 : i32
    %0 = arith.muli %arg0, %c1_i32 : i32
    %1 = arith.addi %0, %arg1 : i32
    %c0_i32 = arith.constant 0 : i32
    %c0_i32_0 = arith.constant 0 : i32
    return %1, %c0_i32 : i32, i32
  }
  func.func @transform_1(%arg0: i32, %arg1: i32) -> (i32, i32) {
    %c1_i32 = arith.constant 1 : i32
    %0 = arith.muli %arg0, %c1_i32 : i32
    %1 = arith.addi %0, %arg1 : i32
    %c0_i32 = arith.constant 0 : i32
    %c0_i32_0 = arith.constant 0 : i32
    return %1, %c0_i32 : i32, i32
  }
  func.func @transform_2(%arg0: i32, %arg1: i32) -> (i32, i32, i32) {
    %c0_i32 = arith.constant 0 : i32
    %c0_i32_0 = arith.constant 0 : i32
    %c0_i32_1 = arith.constant 0 : i32
    return %arg0, %c0_i32, %c0_i32_0 : i32, i32, i32
  }
}

</mosaic_0001>

<bundles_post_ra>
// kernel: tpu_custom_call.1
= control target key start
LH: loop header
LB: loop body
LE: loop exit
PB: predicated region body
PF: predicated region fallthrough
CT: control target
= control target key end

     0   :  { %7 = vsyncpa [#allocation4], 0  ;;  %s213_s0 = inlined_call_operand.hbm [shape: f32[16,128], index: 0, kind: input, shape index: {}]   ;;  %s214_s1 = inlined_call_operand.hbm [shape: f32[16,128], index: 1, kind: input, shape index: {}]   ;;  %s215_s2 = inlined_call_operand.hbm [shape: f32[1,8,128], index: 2, kind: output, shape index: {}]  }
   0x1   :  { %8 = vsyncpa [#allocation7], 0 }
   0x2   :  { %9 = vsyncpa [#allocation5], 0  ;;  %s18_s11 = sshll.u32 %s213_s0, 4  ;;  %s184_s12 = smov [#allocation3]   ;;  %s19_s11 = int_to_ptr.hbm [resolvable:$true] %s18_s11 }
   0x3   :  { %s20_s13 = sshll.u32 %s184_s12, 4  ;;  %s35_s16 = sshll.u32 %s214_s1, 4  ;;  %s21_s13 = int_to_ptr.vmem [resolvable:$true] %s20_s13  ;;  %s36_s16 = int_to_ptr.hbm [resolvable:$true] %s35_s16 }
   0x4   :  { %s185_s17 = smov 128   ;;  %s186_s18 = smov 8  }
   0x5   :  { %26 = dma.hbm_to_vmem [thread:$0]  %s19_s11, 256, %s21_s13, [#allocation4], %s185_s17, %s185_s17, %s186_s18  }
   0x6   :  { %s187_s19 = smov [#allocation6]  }
   0x7   :  { %s37_s20 = sshll.u32 %s187_s19, 4  ;;  %s38_s20 = int_to_ptr.vmem [resolvable:$true] %s37_s20 }
   0x8   :  { %43 = dma.hbm_to_vmem [thread:$0]  %s36_s16, 256, %s38_s20, [#allocation7], %s185_s17, %s185_s17, %s186_s18  }
   0x9   :  { %178 = dma.done.wait [#allocation4], 256  }
   0xa   :  { %179 = vsyncadd [#allocation4], 4294967040 }
   0xb   :  { %180 = dma.done.wait [#allocation7], 256  }
   0xc   :  { %181 = vsyncadd [#allocation7], 4294967040  ;;  %v62_v0 = vld [vmem:[#allocation6] sm:$0xff]  ;;  %v63_v1 = vld [vmem:[#allocation6 + $0x8] sm:$0xff]  ;;  %s188_s0 = smov [#allocation8]   ;;  %s90_s23 = sshll.u32 %s215_s2, 4  ;;  %s91_s23 = int_to_ptr.hbm [resolvable:$true] %s90_s23 }
   0xd   :  { %v64_v2 = vld [vmem:[#allocation3] sm:$0xff]  ;;  %v65_v3 = vld [vmem:[#allocation3 + $0x8] sm:$0xff]  ;;  %s88_s1 = sshll.u32 %s188_s0, 4  ;;  %s89_s1 = int_to_ptr.vmem [resolvable:$true] %s88_s1 }
   0xe   :  { %v66_v4 = vsub.f32 %v62_v0, %v64_v2  ;;  %v67_v5 = vsub.f32 %v63_v1, %v65_v3 }
  0x10   :  { %v68_v6 = vmul.f32 %v66_v4, %v66_v4  ;;  %v69_v7 = vmul.f32 %v67_v5, %v67_v5 }
  0x12   :  { %v81_v8 = vadd.f32 %v69_v7, %v68_v6 }
  0x14   :  { %82 = vst [vmem:[#allocation8] sm:$0xff] %v81_v8 }
  0x15   :  { %93 = dma.vmem_to_hbm [thread:$0]  %s89_s1, 128, %s91_s23, [#allocation5]  }
  0x16   :  { %182 = dma.done.wait [#allocation5], 128  }
  0x17   :  { %183 = vsyncadd [#allocation5], 4294967168 }
  0x18   :  { %98 = vsyncpa [#allocation4], 1 }
  0x19   :  { %99 = vsyncpa [#allocation7], 1 }
  0x1a   :  { %100 = vsyncpa [#allocation5], 1 }

</bundles_post_ra>
